<compile_context>
chip_gen: v5e
topology: v5e:2x2
jax: 0.10.0
libtpu: 0.0.40
codegen_flags: <defaults>
</compile_context>

<pallas_src>
import math
import functools

import jax
import jax.numpy as jnp
from jax import lax
from jax.experimental import pallas as pl
from jax.experimental.pallas import tpu as pltpu

# ----- small BERT-ish config -----
BATCH = 2
SEQ = 8
HIDDEN = 32
NUM_HEADS = 4
HEAD_DIM = HIDDEN // NUM_HEADS


def _self_attention_kernel(x_ref, w_ref, b_ref, o_ref, *,
                           batch, seq_len, num_heads, head_dim):
    """Whole problem in one grid step (everything fits easily in VMEM)."""
    hidden = num_heads * head_dim
    bh = batch * num_heads

    x = x_ref[...]                                              # (B, S, H)

    # Head-major replication of the activations.  Only leading-axis
    # broadcast/reshape: the minor (S, H) tile layout is untouched, so no XLU
    # lane extracts / rotations are generated for the Q/K/V head split.
    xb = jnp.broadcast_to(x[:, None, :, :], (batch, num_heads, seq_len, hidden))
    xb = xb.reshape(bh, seq_len, hidden)                        # (B*NH, S, H)

    # Q/K/V projections as head-batched matmuls (PETLinear standard:
    # x @ W^T + b).  Weights were pre-transposed / stacked per head in the
    # wrapper, the 1/sqrt(head_dim) score scale is folded into Q, and biases
    # are pre-broadcast to (B*NH, S, D) so no sublane broadcast is needed.
    dn_proj = (((2,), (1,)), ((0,), (0,)))
    q = lax.dot_general(xb, w_ref[0], dn_proj,
                        preferred_element_type=jnp.float32) + b_ref[0]
    k = lax.dot_general(xb, w_ref[1], dn_proj,
                        preferred_element_type=jnp.float32) + b_ref[1]
    v = lax.dot_general(xb, w_ref[2], dn_proj,
                        preferred_element_type=jnp.float32) + b_ref[2]

    # Scores for all batches*heads at once; trans-B absorbed into dot_general
    # (contract the last dims), no per-head transpose.
    scores = lax.dot_general(q, k, (((2,), (2,)), ((0,), (0,))),
                             preferred_element_type=jnp.float32)  # (B*NH,S,S)

    # One batched softmax.  attention_mask is None in this instantiation,
    # attention-prob dropout is identity in eval mode, head_mask is None.
    scores = scores - jnp.max(scores, axis=-1, keepdims=True)
    p = jnp.exp(scores)
    p = p * pl.reciprocal(jnp.sum(p, axis=-1, keepdims=True), approx=True)

    ctx = lax.dot_general(p, v, (((2,), (1,)), ((0,), (0,))),
                          preferred_element_type=jnp.float32)     # (B*NH,S,D)

    # Assemble (B, S, H) as values (one lane-concat over heads per batch) and
    # issue a single full-block store instead of per-(batch,head) column
    # stores (avoids 8x masked vst.msk address setup).
    per_batch = [
        jnp.concatenate([ctx[b * num_heads + h] for h in range(num_heads)],
                        axis=-1)                                   # (S, H)
        for b in range(batch)
    ]
    o_ref[...] = jnp.stack(per_batch, axis=0).astype(o_ref.dtype)  # (B, S, H)


def prepare_params(params, *, batch=BATCH, seq_len=SEQ,
                   num_heads=NUM_HEADS, head_dim=HEAD_DIM):
    """One-time constant weight prep (hoisted out of the per-call path)."""
    hidden = num_heads * head_dim
    inv_sqrt_d = 1.0 / math.sqrt(head_dim)

    def per_head_rhs(w):
        # torch Linear weight (out, in) -> (NH, H, D) so that
        # x @ rhs[h] == (x @ W^T)[:, h*D:(h+1)*D]
        return jnp.transpose(w.reshape(num_heads, head_dim, hidden), (0, 2, 1))

    def per_head_bias(b):
        # (H,) -> (NH, S, D), pre-broadcast over the sequence rows.
        return jnp.broadcast_to(b.reshape(num_heads, 1, head_dim),
                                (num_heads, seq_len, head_dim))

    def tile_b(a):
        # (NH, ...) -> (B*NH, ...); batched index is b*NH + h.
        return jnp.tile(a, (batch,) + (1,) * (a.ndim - 1))

    wq = tile_b(per_head_rhs(params["wq"] * inv_sqrt_d))   # scale folded into Q
    wk = tile_b(per_head_rhs(params["wk"]))
    wv = tile_b(per_head_rhs(params["wv"]))
    bq = tile_b(per_head_bias(params["bq"] * inv_sqrt_d))
    bk = tile_b(per_head_bias(params["bk"]))
    bv = tile_b(per_head_bias(params["bv"]))

    return {
        "w_all": jnp.stack([wq, wk, wv], axis=0),   # (3, B*NH, H, D)
        "b_all": jnp.stack([bq, bk, bv], axis=0),   # (3, B*NH, S, D)
    }


def pet_bert_self_attention(x, prepared):
    """x: (B, S, H) float32; prepared: output of prepare_params (constant)."""
    B, S, H = x.shape
    w_all = prepared["w_all"]
    b_all = prepared["b_all"]

    kernel = functools.partial(
        _self_attention_kernel, batch=B, seq_len=S,
        num_heads=NUM_HEADS, head_dim=HEAD_DIM)

    return pl.pallas_call(
        kernel,
        out_shape=jax.ShapeDtypeStruct((B, S, H), jnp.float32),
        grid_spec=pltpu.PrefetchScalarGridSpec(
            num_scalar_prefetch=0,
            grid=(1,),   # single step on every generation (v5e/v6e/v7x)
            in_specs=[
                pl.BlockSpec((B, S, H), lambda i: (0, 0, 0)),
                pl.BlockSpec(w_all.shape, lambda i: (0, 0, 0, 0)),
                pl.BlockSpec(b_all.shape, lambda i: (0, 0, 0, 0)),
            ],
            out_specs=pl.BlockSpec((B, S, H), lambda i: (0, 0, 0)),
        ),
        compiler_params=pltpu.CompilerParams(
            dimension_semantics=("arbitrary",)),
    )(x, w_all, b_all)


def _reference(x, params):
    """Plain-JAX mirror of PETBertSelfAttention.forward (standard, eval mode)."""
    B, S, H = x.shape

    def lin(inp, w, b):
        return jnp.einsum("bsh,oh->bso", inp, w) + b

    q = lin(x, params["wq"], params["bq"])
    k = lin(x, params["wk"], params["bk"])
    v = lin(x, params["wv"], params["bv"])

    def split(t):
        return t.reshape(B, S, NUM_HEADS, HEAD_DIM).transpose(0, 2, 1, 3)

    qh, kh, vh = split(q), split(k), split(v)
    scores = jnp.einsum("bhqd,bhkd->bhqk", qh, kh) / math.sqrt(HEAD_DIM)
    probs = jax.nn.softmax(scores, axis=-1)
    ctx = jnp.einsum("bhqk,bhkd->bhqd", probs, vh)
    return ctx.transpose(0, 2, 1, 3).reshape(B, S, H)


if __name__ == "__main__":
    key = jax.random.PRNGKey(0)
    keys = jax.random.split(key, 8)

    def init(k, shape, scale=0.05):
        return (scale * jax.random.normal(k, shape)).astype(jnp.float32)

    params = {
        "wq": init(keys[0], (HIDDEN, HIDDEN)), "bq": init(keys[1], (HIDDEN,)),
        "wk": init(keys[2], (HIDDEN, HIDDEN)), "bk": init(keys[3], (HIDDEN,)),
        "wv": init(keys[4], (HIDDEN, HIDDEN)), "bv": init(keys[5], (HIDDEN,)),
    }
    x = jax.random.normal(keys[6], (BATCH, SEQ, HIDDEN), dtype=jnp.float32)

    prepared = prepare_params(params)   # one-time constant prep (hoisted)

    out = jax.block_until_ready(pet_bert_self_attention(x, prepared))
    assert out.shape == (BATCH, SEQ, HIDDEN)

    ref = _reference(x, params)
    # Tolerance covers the approximate (EUP) reciprocal in the softmax and the
    # rounding-order change from folding the score scale into the Q weights.
    assert jnp.allclose(out, ref, atol=5e-3, rtol=5e-3), "mismatch vs reference"

    # TODO(synk): attention_mask / head_mask / encoder_hidden_states paths and
    # training-mode dropout are not exercised (module called with defaults,
    # eval semantics).
    print("KERNEL_OK")
</pallas_src>

<mosaic_0001>
module attributes {stable_mosaic.version = 11 : i64} {
  func.func @_self_attention_kernel(%arg0: i32, %arg1: memref<2x8x32xf32, #tpu.memory_space<vmem>>, %arg2: memref<3x8x32x8xf32, #tpu.memory_space<vmem>>, %arg3: memref<3x8x8x8xf32, #tpu.memory_space<vmem>>, %arg4: memref<2x8x32xf32, #tpu.memory_space<vmem>>) attributes {dimension_semantics = [#tpu.dimension_semantics<arbitrary>], iteration_bounds = array<i64: 1>, scalar_prefetch = 0 : i64, scratch_operands = 0 : i64, tpu.core_type = #tpu.core_type<tc>, window_params = [{pipeline_mode = #tpu.pipeline_mode<synchronous>, transform_indices = @transform_0, window_bounds = array<i64: 2, 8, 32>}, {pipeline_mode = #tpu.pipeline_mode<synchronous>, transform_indices = @transform_1, window_bounds = array<i64: 3, 8, 32, 8>}, {pipeline_mode = #tpu.pipeline_mode<synchronous>, transform_indices = @transform_2, window_bounds = array<i64: 3, 8, 8, 8>}, {pipeline_mode = #tpu.pipeline_mode<synchronous>, transform_indices = @transform_3, window_bounds = array<i64: 2, 8, 32>}]} {
    %c0 = arith.constant 0 : index
    %c0_0 = arith.constant 0 : index
    %c0_1 = arith.constant 0 : index
    %0 = vector.load %arg1[%c0, %c0_0, %c0_1] : memref<2x8x32xf32, #tpu.memory_space<vmem>>, vector<2x8x32xf32>
    %1 = vector.shape_cast %0 : vector<2x8x32xf32> to vector<2x1x8x32xf32>
    %2 = vector.shape_cast %1 : vector<2x1x8x32xf32> to vector<2x1x8x32xf32>
    %3 = vector.broadcast %2 : vector<2x1x8x32xf32> to vector<2x4x8x32xf32>
    %4 = vector.shape_cast %3 : vector<2x4x8x32xf32> to vector<8x8x32xf32>
    %c0_2 = arith.constant 0 : index
    %c0_3 = arith.constant 0 : index
    %c0_4 = arith.constant 0 : index
    %c0_5 = arith.constant 0 : index
    %5 = vector.load %arg2[%c0_2, %c0_3, %c0_4, %c0_5] : memref<3x8x32x8xf32, #tpu.memory_space<vmem>>, vector<1x8x32x8xf32>
    %6 = vector.shape_cast %5 : vector<1x8x32x8xf32> to vector<8x32x8xf32>
    %cst = arith.constant dense<0.000000e+00> : vector<8x8x8xf32>
    %7 = tpu.matmul %4, %6, %cst {dimension_numbers = #tpu.dot_dimension_numbers<[2], [1], [1], [2], [0, 0, 0, 1, 1, 2], [0], [0]>} : vector<8x8x32xf32>, vector<8x32x8xf32>, vector<8x8x8xf32> -> vector<8x8x8xf32>
    %c0_6 = arith.constant 0 : index
    %c0_7 = arith.constant 0 : index
    %c0_8 = arith.constant 0 : index
    %c0_9 = arith.constant 0 : index
    %8 = vector.load %arg3[%c0_6, %c0_7, %c0_8, %c0_9] : memref<3x8x8x8xf32, #tpu.memory_space<vmem>>, vector<1x8x8x8xf32>
    %9 = vector.shape_cast %8 : vector<1x8x8x8xf32> to vector<8x8x8xf32>
    %10 = arith.addf %7, %9 : vector<8x8x8xf32>
    %c1 = arith.constant 1 : index
    %c0_10 = arith.constant 0 : index
    %c0_11 = arith.constant 0 : index
    %c0_12 = arith.constant 0 : index
    %11 = vector.load %arg2[%c1, %c0_10, %c0_11, %c0_12] : memref<3x8x32x8xf32, #tpu.memory_space<vmem>>, vector<1x8x32x8xf32>
    %12 = vector.shape_cast %11 : vector<1x8x32x8xf32> to vector<8x32x8xf32>
    %cst_13 = arith.constant dense<0.000000e+00> : vector<8x8x8xf32>
    %13 = tpu.matmul %4, %12, %cst_13 {dimension_numbers = #tpu.dot_dimension_numbers<[2], [1], [1], [2], [0, 0, 0, 1, 1, 2], [0], [0]>} : vector<8x8x32xf32>, vector<8x32x8xf32>, vector<8x8x8xf32> -> vector<8x8x8xf32>
    %c1_14 = arith.constant 1 : index
    %c0_15 = arith.constant 0 : index
    %c0_16 = arith.constant 0 : index
    %c0_17 = arith.constant 0 : index
    %14 = vector.load %arg3[%c1_14, %c0_15, %c0_16, %c0_17] : memref<3x8x8x8xf32, #tpu.memory_space<vmem>>, vector<1x8x8x8xf32>
    %15 = vector.shape_cast %14 : vector<1x8x8x8xf32> to vector<8x8x8xf32>
    %16 = arith.addf %13, %15 : vector<8x8x8xf32>
    %c2 = arith.constant 2 : index
    %c0_18 = arith.constant 0 : index
    %c0_19 = arith.constant 0 : index
    %c0_20 = arith.constant 0 : index
    %17 = vector.load %arg2[%c2, %c0_18, %c0_19, %c0_20] : memref<3x8x32x8xf32, #tpu.memory_space<vmem>>, vector<1x8x32x8xf32>
    %18 = vector.shape_cast %17 : vector<1x8x32x8xf32> to vector<8x32x8xf32>
    %cst_21 = arith.constant dense<0.000000e+00> : vector<8x8x8xf32>
    %19 = tpu.matmul %4, %18, %cst_21 {dimension_numbers = #tpu.dot_dimension_numbers<[2], [1], [1], [2], [0, 0, 0, 1, 1, 2], [0], [0]>} : vector<8x8x32xf32>, vector<8x32x8xf32>, vector<8x8x8xf32> -> vector<8x8x8xf32>
    %c2_22 = arith.constant 2 : index
    %c0_23 = arith.constant 0 : index
    %c0_24 = arith.constant 0 : index
    %c0_25 = arith.constant 0 : index
    %20 = vector.load %arg3[%c2_22, %c0_23, %c0_24, %c0_25] : memref<3x8x8x8xf32, #tpu.memory_space<vmem>>, vector<1x8x8x8xf32>
    %21 = vector.shape_cast %20 : vector<1x8x8x8xf32> to vector<8x8x8xf32>
    %22 = arith.addf %19, %21 : vector<8x8x8xf32>
    %cst_26 = arith.constant dense<0.000000e+00> : vector<8x8x8xf32>
    %23 = tpu.matmul %10, %16, %cst_26 {dimension_numbers = #tpu.dot_dimension_numbers<[2], [2], [1], [1], [0, 0, 0, 1, 1, 1], [0], [0]>} : vector<8x8x8xf32>, vector<8x8x8xf32>, vector<8x8x8xf32> -> vector<8x8x8xf32>
    %cst_27 = arith.constant dense<0xFF800000> : vector<8x8xf32>
    %24 = vector.multi_reduction <maximumf>, %23, %cst_27 [2] : vector<8x8x8xf32> to vector<8x8xf32>
    %25 = vector.shape_cast %24 : vector<8x8xf32> to vector<8x8x1xf32>
    %26 = vector.broadcast %25 : vector<8x8x1xf32> to vector<8x8x8xf32>
    %27 = arith.subf %23, %26 : vector<8x8x8xf32>
    %28 = math.exp %27 : vector<8x8x8xf32>
    %cst_28 = arith.constant dense<0.000000e+00> : vector<8x8xf32>
    %29 = vector.multi_reduction <add>, %28, %cst_28 [2] : vector<8x8x8xf32> to vector<8x8xf32>
    %30 = vector.shape_cast %29 : vector<8x8xf32> to vector<8x8x1xf32>
    %31 = tpu.reciprocal %30 {approx = true} : vector<8x8x1xf32> -> vector<8x8x1xf32>
    %32 = vector.broadcast %31 : vector<8x8x1xf32> to vector<8x8x8xf32>
    %33 = arith.mulf %28, %32 : vector<8x8x8xf32>
    %cst_29 = arith.constant dense<0.000000e+00> : vector<8x8x8xf32>
    %34 = tpu.matmul %33, %22, %cst_29 {dimension_numbers = #tpu.dot_dimension_numbers<[2], [1], [1], [2], [0, 0, 0, 1, 1, 2], [0], [0]>} : vector<8x8x8xf32>, vector<8x8x8xf32>, vector<8x8x8xf32> -> vector<8x8x8xf32>
    %35 = vector.extract_strided_slice %34 {offsets = [0, 0, 0], sizes = [1, 8, 8], strides = [1, 1, 1]} : vector<8x8x8xf32> to vector<1x8x8xf32>
    %36 = vector.shape_cast %35 : vector<1x8x8xf32> to vector<8x8xf32>
    %37 = vector.extract_strided_slice %34 {offsets = [1, 0, 0], sizes = [1, 8, 8], strides = [1, 1, 1]} : vector<8x8x8xf32> to vector<1x8x8xf32>
    %38 = vector.shape_cast %37 : vector<1x8x8xf32> to vector<8x8xf32>
    %39 = vector.extract_strided_slice %34 {offsets = [2, 0, 0], sizes = [1, 8, 8], strides = [1, 1, 1]} : vector<8x8x8xf32> to vector<1x8x8xf32>
    %40 = vector.shape_cast %39 : vector<1x8x8xf32> to vector<8x8xf32>
    %41 = vector.extract_strided_slice %34 {offsets = [3, 0, 0], sizes = [1, 8, 8], strides = [1, 1, 1]} : vector<8x8x8xf32> to vector<1x8x8xf32>
    %42 = vector.shape_cast %41 : vector<1x8x8xf32> to vector<8x8xf32>
    %43 = tpu.concatenate %36, %38, %40, %42 in 1 : vector<8x8xf32>, vector<8x8xf32>, vector<8x8xf32>, vector<8x8xf32> -> vector<8x32xf32>
    %44 = vector.extract_strided_slice %34 {offsets = [4, 0, 0], sizes = [1, 8, 8], strides = [1, 1, 1]} : vector<8x8x8xf32> to vector<1x8x8xf32>
    %45 = vector.shape_cast %44 : vector<1x8x8xf32> to vector<8x8xf32>
    %46 = vector.extract_strided_slice %34 {offsets = [5, 0, 0], sizes = [1, 8, 8], strides = [1, 1, 1]} : vector<8x8x8xf32> to vector<1x8x8xf32>
    %47 = vector.shape_cast %46 : vector<1x8x8xf32> to vector<8x8xf32>
    %48 = vector.extract_strided_slice %34 {offsets = [6, 0, 0], sizes = [1, 8, 8], strides = [1, 1, 1]} : vector<8x8x8xf32> to vector<1x8x8xf32>
    %49 = vector.shape_cast %48 : vector<1x8x8xf32> to vector<8x8xf32>
    %50 = vector.extract_strided_slice %34 {offsets = [7, 0, 0], sizes = [1, 8, 8], strides = [1, 1, 1]} : vector<8x8x8xf32> to vector<1x8x8xf32>
    %51 = vector.shape_cast %50 : vector<1x8x8xf32> to vector<8x8xf32>
    %52 = tpu.concatenate %45, %47, %49, %51 in 1 : vector<8x8xf32>, vector<8x8xf32>, vector<8x8xf32>, vector<8x8xf32> -> vector<8x32xf32>
    %53 = vector.shape_cast %43 : vector<8x32xf32> to vector<1x8x32xf32>
    %54 = vector.shape_cast %52 : vector<8x32xf32> to vector<1x8x32xf32>
    %55 = tpu.concatenate %53, %54 in 0 : vector<1x8x32xf32>, vector<1x8x32xf32> -> vector<2x8x32xf32>
    %c0_30 = arith.constant 0 : index
    %c0_31 = arith.constant 0 : index
    %c0_32 = arith.constant 0 : index
    %56 = vector.load %arg4[%c0_30, %c0_31, %c0_32] : memref<2x8x32xf32, #tpu.memory_space<vmem>>, vector<2x8x32xf32>
    tpu.vector_store %arg4[%c0_30, %c0_31, %c0_32], %55 {strides = array<i32>} : memref<2x8x32xf32, #tpu.memory_space<vmem>>, vector<2x8x32xf32>,
    return
  }
  func.func @transform_0(%arg0: i32) -> (i32, i32, i32) {
    %c0_i32 = arith.constant 0 : i32
    %c0_i32_0 = arith.constant 0 : i32
    %c0_i32_1 = arith.constant 0 : i32
    %c0_i32_2 = arith.constant 0 : i32
    return %c0_i32, %c0_i32_0, %c0_i32_1 : i32, i32, i32
  }
  func.func @transform_1(%arg0: i32) -> (i32, i32, i32, i32) {
    %c0_i32 = arith.constant 0 : i32
    %c0_i32_0 = arith.constant 0 : i32
    %c0_i32_1 = arith.constant 0 : i32
    %c0_i32_2 = arith.constant 0 : i32
    %c0_i32_3 = arith.constant 0 : i32
    return %c0_i32, %c0_i32_0, %c0_i32_1, %c0_i32_2 : i32, i32, i32, i32
  }
  func.func @transform_2(%arg0: i32) -> (i32, i32, i32, i32) {
    %c0_i32 = arith.constant 0 : i32
    %c0_i32_0 = arith.constant 0 : i32
    %c0_i32_1 = arith.constant 0 : i32
    %c0_i32_2 = arith.constant 0 : i32
    %c0_i32_3 = arith.constant 0 : i32
    return %c0_i32, %c0_i32_0, %c0_i32_1, %c0_i32_2 : i32, i32, i32, i32
  }
  func.func @transform_3(%arg0: i32) -> (i32, i32, i32) {
    %c0_i32 = arith.constant 0 : i32
    %c0_i32_0 = arith.constant 0 : i32
    %c0_i32_1 = arith.constant 0 : i32
    %c0_i32_2 = arith.constant 0 : i32
    return %c0_i32, %c0_i32_0, %c0_i32_1 : i32, i32, i32
  }
}

</mosaic_0001>

<bundles_post_ra>
// kernel: tpu_custom_call.1
= control target key start
LH: loop header
LB: loop body
LE: loop exit
PB: predicated region body
PF: predicated region fallthrough
CT: control target
= control target key end

     0   :  { %vm57_vm0 = vcmask 261120   ;;  %s1847_s0 = inlined_call_operand.vmem [shape: f32[2,8,32], index: 0, kind: input, shape index: {}]   ;;  %s1848_s1 = inlined_call_operand.vmem [shape: f32[3,8,32,8], index: 1, kind: input, shape index: {}]   ;;  %s1849_s2 = inlined_call_operand.vmem [shape: f32[3,8,8,8], index: 2, kind: input, shape index: {}]   ;;  %s1850_s3 = inlined_call_operand.hbm [shape: f32[2,8,32], index: 3, kind: output, shape index: {}]  }
   0x1   :  { %v24_v0 = vld [vmem:[%s1848_s1 + $0x38] sm:$0xff]  ;;  %v23_v3 = vld [vmem:[%s1848_s1 + $0x30] sm:$0xff]  ;;  %v22_v6 = vld [vmem:[%s1848_s1 + $0x28] sm:$0xff] }
   0x2   :  { %v28_v1 = vld [vmem:[%s1848_s1 + $0x58] sm:$0xff]  ;;  %93 = vmatpush.msra.mxu1 %v24_v0  ;;  %v27_v4 = vld [vmem:[%s1848_s1 + $0x50] sm:$0xff]  ;;  %v26_v7 = vld [vmem:[%s1848_s1 + $0x48] sm:$0xff] }
   0x3   :  { %v32_v2 = vld [vmem:[%s1848_s1 + $0x78] sm:$0xff]  ;;  %113 = vmatpush.msra.mxu2 %v28_v1  ;;  %v31_v5 = vld [vmem:[%s1848_s1 + $0x70] sm:$0xff]  ;;  %v30_v8 = vld [vmem:[%s1848_s1 + $0x68] sm:$0xff] }
   0x4   :  { %133 = vmatpush.msra.mxu3 %v32_v2  ;;  %94 = vmatpush.msra.mxu1 %v23_v3  ;;  %v21_v9 = vld [vmem:[%s1848_s1 + $0x20] sm:$0xff]  ;;  %v40_v13 = vld [vmem:[%s1848_s1 + $0xb8] sm:$0xff]  ;;  %v39_v16 = vld [vmem:[%s1848_s1 + $0xb0] sm:$0xff] }
   0x5   :  { %114 = vmatpush.msra.mxu2 %v27_v4  ;;  %v25_v10 = vld [vmem:[%s1848_s1 + $0x40] sm:$0xff]  ;;  %v44_v14 = vld [vmem:[%s1848_s1 + $0xd8] sm:$0xff]  ;;  %v43_v17 = vld [vmem:[%s1848_s1 + $0xd0] sm:$0xff] }
   0x6   :  { %134 = vmatpush.msra.mxu3 %v31_v5  ;;  %95 = vmatpush.msra.mxu1 %v22_v6  ;;  %v29_v11 = vld [vmem:[%s1848_s1 + $0x60] sm:$0xff]  ;;  %v48_v15 = vld [vmem:[%s1848_s1 + $0xf8] sm:$0xff]  ;;  %v47_v18 = vld [vmem:[%s1848_s1 + $0xf0] sm:$0xff] }
   0x7   :  { %115 = vmatpush.msra.mxu2 %v26_v7  ;;  %v1416_v12 = vld [vmem:[%s1847_s0] sm:$0xff]  ;;  %v20_v19 = vld [vmem:[%s1848_s1 + $0x18] sm:$0xff]  ;;  %v38_v20 = vld [vmem:[%s1848_s1 + $0xa8] sm:$0xff] }
   0x8   :  { %135 = vmatpush.msra.mxu3 %v30_v8  ;;  %96 = vmatpush.msra.mxu1 %v21_v9  ;;  %v42_v21 = vld [vmem:[%s1848_s1 + $0xc8] sm:$0xff]  ;;  %v19_v23 = vld [vmem:[%s1848_s1 + $0x10] sm:$0xff]  ;;  %v37_v24 = vld [vmem:[%s1848_s1 + $0xa0] sm:$0xff] }
   0x9   :  { %116 = vmatpush.msra.mxu2 %v25_v10  ;;  %1162 = vmatmul.msk.f32.vlgmr.msra.gmra.mxu1 %vm57_vm0, %v1416_v12  ;;  %v46_v22 = vld [vmem:[%s1848_s1 + $0xe8] sm:$0xff]  ;;  %v41_v25 = vld [vmem:[%s1848_s1 + $0xc0] sm:$0xff]  ;;  %v1176_v29 = vld [vmem:[%s1848_s1 + $0x138] sm:$0xff] }
   0xa   :  { %136 = vmatpush.msra.mxu3 %v29_v11  ;;  %1163 = vmatmul.msk.f32.vlgmr.msra.gmra.mxu2 %vm57_vm0, %v1416_v12  ;;  %v18_v26 = vld [vmem:[%s1848_s1 + $0x8] sm:$0xff]  ;;  %v45_v27 = vld [vmem:[%s1848_s1 + $0xe0] sm:$0xff]  ;;  %v1180_v30 = vld [vmem:[%s1848_s1 + $0x158] sm:$0xff] }
   0xb   :  { %1164 = vmatmul.msk.f32.vlgmr.msra.gmra.mxu3 %vm57_vm0, %v1416_v12  ;;  %176 = vmatpush.msrb.mxu1 %v40_v13  ;;  %v1472_v28 = vld [vmem:[%s1847_s0 + $0x8] sm:$0xff]  ;;  %v1184_v31 = vld [vmem:[%s1848_s1 + $0x178] sm:$0xff]  ;;  %v17_v32 = vld [vmem:[%s1848_s1] sm:$0xff] }
   0xc   :  { %196 = vmatpush.msrb.mxu2 %v44_v14  ;;  %216 = vmatpush.msrb.mxu3 %v48_v15  ;;  %v1175_v33 = vld [vmem:[%s1848_s1 + $0x130] sm:$0xff]  ;;  %v1174_v36 = vld [vmem:[%s1848_s1 + $0x128] sm:$0xff]  ;;  %v36_v39 = vld [vmem:[%s1848_s1 + $0x98] sm:$0xff] }
   0xd   :  { %73 = vmatpush.msra.mxu0 %v20_v19  ;;  %177 = vmatpush.msrb.mxu1 %v39_v16  ;;  %v1179_v34 = vld [vmem:[%s1848_s1 + $0x150] sm:$0xff]  ;;  %v1178_v37 = vld [vmem:[%s1848_s1 + $0x148] sm:$0xff]  ;;  %v1173_v40 = vld [vmem:[%s1848_s1 + $0x120] sm:$0xff] }
   0xe   :  { %197 = vmatpush.msrb.mxu2 %v43_v17  ;;  %217 = vmatpush.msrb.mxu3 %v47_v18  ;;  %v1183_v35 = vld [vmem:[%s1848_s1 + $0x170] sm:$0xff]  ;;  %v1182_v38 = vld [vmem:[%s1848_s1 + $0x168] sm:$0xff]  ;;  %v1177_v41 = vld [vmem:[%s1848_s1 + $0x140] sm:$0xff] }
   0xf   :  { %74 = vmatpush.msra.mxu0 %v19_v23  ;;  %178 = vmatpush.msrb.mxu1 %v38_v20 }
  0x10   :  { %198 = vmatpush.msrb.mxu2 %v42_v21  ;;  %218 = vmatpush.msrb.mxu3 %v46_v22 }
  0x11   :  { %75 = vmatpush.msra.mxu0 %v18_v26  ;;  %179 = vmatpush.msrb.mxu1 %v37_v24 }
  0x12   :  { %199 = vmatpush.msrb.mxu2 %v41_v25  ;;  %219 = vmatpush.msrb.mxu3 %v45_v27 }
  0x13   :  { %1166 = vmatmul.msk.f32.vlgmr.msrb.gmra.mxu1 %vm57_vm0, %v1472_v28  ;;  %1167 = vmatmul.msk.f32.vlgmr.msrb.gmra.mxu2 %vm57_vm0, %v1472_v28 }
  0x14   :  { %1168 = vmatmul.msk.f32.vlgmr.msrb.gmra.mxu3 %vm57_vm0, %v1472_v28  ;;  %298 = vmatpush.msra.mxu1 %v1176_v29 }
  0x15   :  { %318 = vmatpush.msra.mxu2 %v1180_v30  ;;  %338 = vmatpush.msra.mxu3 %v1184_v31 }
  0x16   :  { %76 = vmatpush.msra.mxu0 %v17_v32  ;;  %299 = vmatpush.msra.mxu1 %v1175_v33 }
  0x17   :  { %319 = vmatpush.msra.mxu2 %v1179_v34  ;;  %339 = vmatpush.msra.mxu3 %v1183_v35 }
  0x18   :  { %1161 = vmatmul.msk.f32.vlgmr.msra.gmra.mxu0 %vm57_vm0, %v1416_v12 }
  0x19   :  { %8 = vsyncpa [#allocation3], 0  ;;  %300 = vmatpush.msra.mxu1 %v1174_v36  ;;  %320 = vmatpush.msra.mxu2 %v1178_v37  ;;  %v1181_v42 = vld [vmem:[%s1848_s1 + $0x160] sm:$0xff]  ;;  %v1196_v43 = vld [vmem:[%s1848_s1 + $0x1d8] sm:$0xff]  ;;  %vm628_vm1 = vcmask 64512   ;;  %s1353_s4 = smov 16  }
  0x1a   :  { %340 = vmatpush.msra.mxu3 %v1182_v38  ;;  %156 = vmatpush.msrb.mxu0 %v36_v39  ;;  %v1200_v44 = vld [vmem:[%s1848_s1 + $0x1f8] sm:$0xff]  ;;  %v35_v45 = vld [vmem:[%s1848_s1 + $0x90] sm:$0xff]  ;;  %v34_v49 = vld [vmem:[%s1848_s1 + $0x88] sm:$0xff]  ;;  %s1354_s5 = smov 24   ;;  %vm1124_vm2 = vcmask 195584   ;;  %vm1122_vm3 = vcmask 130048  }
  0x1b   :  { %301 = vmatpush.msra.mxu1 %v1173_v40  ;;  %321 = vmatpush.msra.mxu2 %v1177_v41  ;;  %v1192_v46 = vld [vmem:[%s1848_s1 + $0x1b8] sm:$0xff]  ;;  %v1195_v47 = vld [vmem:[%s1848_s1 + $0x1d0] sm:$0xff]  ;;  %v1194_v51 = vld [vmem:[%s1848_s1 + $0x1c8] sm:$0xff]  ;;  %s1355_s6 = smov [#allocation2]   ;;  %s1149_s10 = sshll.u32 %s1850_s3, 4  ;;  %s1150_s10 = int_to_ptr.hbm [resolvable:$true] %s1149_s10 }
  0x1c   :  { %341 = vmatpush.msra.mxu3 %v1181_v42  ;;  %1210 = vmatmul.msk.f32.vlgmr.msra.gmra.mxu1 %vm57_vm0, %v1416_v12  ;;  %v1199_v48 = vld [vmem:[%s1848_s1 + $0x1f0] sm:$0xff]  ;;  %v1198_v52 = vld [vmem:[%s1848_s1 + $0x1e8] sm:$0xff]  ;;  %v33_v53 = vld [vmem:[%s1848_s1 + $0x80] sm:$0xff]  ;;  %s1147_s7 = sshll.u32 %s1355_s6, 4  ;;  %s1356_s11 = smov 128   ;;  %s1148_s7 = int_to_ptr.vmem [resolvable:$true] %s1147_s7 }
  0x1d   :  { %1211 = vmatmul.msk.f32.vlgmr.msra.gmra.mxu2 %vm57_vm0, %v1416_v12  ;;  %1212 = vmatmul.msk.f32.vlgmr.msra.gmra.mxu3 %vm57_vm0, %v1416_v12  ;;  %v1191_v50 = vld [vmem:[%s1848_s1 + $0x1b0] sm:$0xff]  ;;  %v1190_v54 = vld [vmem:[%s1848_s1 + $0x1a8] sm:$0xff]  ;;  %v1193_v55 = vld [vmem:[%s1848_s1 + $0x1c0] sm:$0xff] }
  0x1e   :  { %398 = vmatpush.msrb.mxu2 %v1196_v43  ;;  %418 = vmatpush.msrb.mxu3 %v1200_v44  ;;  %v1197_v56 = vld [vmem:[%s1848_s1 + $0x1e0] sm:$0xff]  ;;  %v1172_v58 = vld [vmem:[%s1848_s1 + $0x118] sm:$0xff]  ;;  %v1171_v60 = vld [vmem:[%s1848_s1 + $0x110] sm:$0xff] }
  0x1f   :  { %157 = vmatpush.msrb.mxu0 %v35_v45  ;;  %378 = vmatpush.msrb.mxu1 %v1192_v46  ;;  %v1189_v57 = vld [vmem:[%s1848_s1 + $0x1a0] sm:$0xff]  ;;  %v1224_v59 = vld [vmem:[%s1848_s1 + $0x238] sm:$0xff]  ;;  %v1170_v61 = vld [vmem:[%s1848_s1 + $0x108] sm:$0xff] }
  0x20   :  { %399 = vmatpush.msrb.mxu2 %v1195_v47  ;;  %419 = vmatpush.msrb.mxu3 %v1199_v48  ;;  %v1169_v62 = vld [vmem:[%s1848_s1 + $0x100] sm:$0xff]  ;;  %v1188_v63 = vld [vmem:[%s1848_s1 + $0x198] sm:$0xff]  ;;  %v1187_v0 = vld [vmem:[%s1848_s1 + $0x190] sm:$0xff] }
  0x21   :  { %158 = vmatpush.msrb.mxu0 %v34_v49  ;;  %379 = vmatpush.msrb.mxu1 %v1191_v50  ;;  %v1186_v1 = vld [vmem:[%s1848_s1 + $0x188] sm:$0xff]  ;;  %v1185_v2 = vld [vmem:[%s1848_s1 + $0x180] sm:$0xff]  ;;  %v1223_v3 = vld [vmem:[%s1848_s1 + $0x230] sm:$0xff] }
  0x22   :  { %400 = vmatpush.msrb.mxu2 %v1194_v51  ;;  %420 = vmatpush.msrb.mxu3 %v1198_v52  ;;  %v1222_v4 = vld [vmem:[%s1848_s1 + $0x228] sm:$0xff]  ;;  %v1228_v5 = vld [vmem:[%s1848_s1 + $0x258] sm:$0xff]  ;;  %v1221_v7 = vld [vmem:[%s1848_s1 + $0x220] sm:$0xff] }
  0x23   :  { %159 = vmatpush.msrb.mxu0 %v33_v53  ;;  %380 = vmatpush.msrb.mxu1 %v1190_v54  ;;  %v1232_v6 = vld [vmem:[%s1848_s1 + $0x278] sm:$0xff]  ;;  %v1227_v8 = vld [vmem:[%s1848_s1 + $0x250] sm:$0xff]  ;;  %v1226_v11 = vld [vmem:[%s1848_s1 + $0x248] sm:$0xff] }
  0x24   :  { %401 = vmatpush.msrb.mxu2 %v1193_v55  ;;  %421 = vmatpush.msrb.mxu3 %v1197_v56  ;;  %v1231_v9 = vld [vmem:[%s1848_s1 + $0x270] sm:$0xff]  ;;  %v1240_v10 = vld [vmem:[%s1848_s1 + $0x2b8] sm:$0xff]  ;;  %v1230_v13 = vld [vmem:[%s1848_s1 + $0x268] sm:$0xff] }
  0x25   :  { %1215 = vmatmul.msk.f32.vlgmr.msrb.gmra.mxu2 %vm57_vm0, %v1472_v28  ;;  %1216 = vmatmul.msk.f32.vlgmr.msrb.gmra.mxu3 %vm57_vm0, %v1472_v28  ;;  %v1239_v14 = vld [vmem:[%s1848_s1 + $0x2b0] sm:$0xff]  ;;  %v1225_v15 = vld [vmem:[%s1848_s1 + $0x240] sm:$0xff]  ;;  %v1238_v17 = vld [vmem:[%s1848_s1 + $0x2a8] sm:$0xff] }
  0x26   :  { %1165 = vmatmul.msk.f32.vlgmr.msrb.gmra.mxu0 %vm57_vm0, %v1472_v28  ;;  %381 = vmatpush.msrb.mxu1 %v1189_v57  ;;  %v1229_v16 = vld [vmem:[%s1848_s1 + $0x260] sm:$0xff]  ;;  %v1244_v18 = vld [vmem:[%s1848_s1 + $0x2d8] sm:$0xff]  ;;  %v1243_v21 = vld [vmem:[%s1848_s1 + $0x2d0] sm:$0xff] }
  0x27   :  { %278 = vmatpush.msra.mxu0 %v1172_v58  ;;  %1214 = vmatmul.msk.f32.vlgmr.msrb.gmra.mxu1 %vm57_vm0, %v1472_v28  ;;  %v1237_v19 = vld [vmem:[%s1848_s1 + $0x2a0] sm:$0xff]  ;;  %v1248_v20 = vld [vmem:[%s1848_s1 + $0x2f8] sm:$0xff]  ;;  %v1247_v22 = vld [vmem:[%s1848_s1 + $0x2f0] sm:$0xff] }
  0x28   :  { %500 = vmatpush.msra.mxu1 %v1224_v59  ;;  %520 = vmatpush.msra.mxu2 %v1228_v5  ;;  %v1242_v23 = vld [vmem:[%s1848_s1 + $0x2c8] sm:$0xff]  ;;  %v1220_v25 = vld [vmem:[%s1848_s1 + $0x218] sm:$0xff]  ;;  %v1241_v26 = vld [vmem:[%s1848_s1 + $0x2c0] sm:$0xff] }
  0x29   :  { %279 = vmatpush.msra.mxu0 %v1171_v60  ;;  %540 = vmatpush.msra.mxu3 %v1232_v6  ;;  %v1246_v24 = vld [vmem:[%s1848_s1 + $0x2e8] sm:$0xff]  ;;  %v1245_v27 = vld [vmem:[%s1848_s1 + $0x2e0] sm:$0xff]  ;;  %v1219_v29 = vld [vmem:[%s1848_s1 + $0x210] sm:$0xff] }
  0x2a   :  { %501 = vmatpush.msra.mxu1 %v1223_v3  ;;  %521 = vmatpush.msra.mxu2 %v1227_v8  ;;  %v1218_v30 = vld [vmem:[%s1848_s1 + $0x208] sm:$0xff]  ;;  %v1217_v31 = vld [vmem:[%s1848_s1 + $0x200] sm:$0xff]  ;;  %v1236_v32 = vld [vmem:[%s1848_s1 + $0x298] sm:$0xff] }
  0x2b   :  { %280 = vmatpush.msra.mxu0 %v1170_v61  ;;  %541 = vmatpush.msra.mxu3 %v1231_v9  ;;  %v1235_v33 = vld [vmem:[%s1848_s1 + $0x290] sm:$0xff]  ;;  %v1234_v35 = vld [vmem:[%s1848_s1 + $0x288] sm:$0xff]  ;;  %v1233_v36 = vld [vmem:[%s1848_s1 + $0x280] sm:$0xff] }
  0x2c   :  { %502 = vmatpush.msra.mxu1 %v1222_v4  ;;  %522 = vmatpush.msra.mxu2 %v1226_v11  ;;  %v1202_v41 = vld [vmem:[%s1849_s2 + $0x48] sm:$0xff]  ;;  %v1204_v47 = vld [vmem:[%s1849_s2 + $0x58] sm:$0xff]  ;;  %v51_v50 = vld [vmem:[%s1849_s2 + $0x10] sm:$0xff] }
  0x2d   :  { %281 = vmatpush.msra.mxu0 %v1169_v62  ;;  %542 = vmatpush.msra.mxu3 %v1230_v13  ;;  %v50_v42 = vld [vmem:[%s1849_s2 + $0x8] sm:$0xff]  ;;  %v52_v51 = vld [vmem:[%s1849_s2 + $0x18] sm:$0xff]  ;;  %v1207_v62 = vld [vmem:[%s1849_s2 + $0x70] sm:$0xff] }
  0x2e   :  { %1209 = vmatmul.msk.f32.vlgmr.msra.gmra.mxu0 %vm57_vm0, %v1416_v12  ;;  %503 = vmatpush.msra.mxu1 %v1221_v7  ;;  %v1206_v54 = vld [vmem:[%s1849_s2 + $0x68] sm:$0xff]  ;;  %v56_v3 = vld [vmem:[%s1849_s2 + $0x38] sm:$0xff]  ;;  %v1201_v6 = vld [vmem:[%s1849_s2 + $0x40] sm:$0xff] }
  0x2f   :  { %358 = vmatpush.msrb.mxu0 %v1188_v63  ;;  %1258 = vmatmul.msk.f32.vlgmr.msra.gmra.mxu1 %vm57_vm0, %v1416_v12  ;;  %v54_v55 = vld [vmem:[%s1849_s2 + $0x28] sm:$0xff]  ;;  %v1208_v63 = vld [vmem:[%s1849_s2 + $0x78] sm:$0xff]  ;;  %v49_v7 = vld [vmem:[%s1849_s2] sm:$0xff] }
  0x30   :  { %580 = vmatpush.msrb.mxu1 %v1240_v10  ;;  %523 = vmatpush.msra.mxu2 %v1225_v15  ;;  %v53_v15 = vld [vmem:[%s1849_s2 + $0x20] sm:$0xff] }
  0x31   :  { %359 = vmatpush.msrb.mxu0 %v1187_v0  ;;  %543 = vmatpush.msra.mxu3 %v1229_v16 }
  0x32   :  { %581 = vmatpush.msrb.mxu1 %v1239_v14  ;;  %1259 = vmatmul.msk.f32.vlgmr.msra.gmra.mxu2 %vm57_vm0, %v1416_v12  ;;  %v1205_v14 = vld [vmem:[%s1849_s2 + $0x60] sm:$0xff] }
  0x33   :  { %360 = vmatpush.msrb.mxu0 %v1186_v1  ;;  %1260 = vmatmul.msk.f32.vlgmr.msra.gmra.mxu3 %vm57_vm0, %v1416_v12 }
  0x34   :  { %582 = vmatpush.msrb.mxu1 %v1238_v17  ;;  %600 = vmatpush.msrb.mxu2 %v1244_v18 }
  0x35   :  { %361 = vmatpush.msrb.mxu0 %v1185_v2  ;;  %620 = vmatpush.msrb.mxu3 %v1248_v20  ;;  %v55_v2 = vld [vmem:[%s1849_s2 + $0x30] sm:$0xff] }
  0x36   :  { %1213 = vmatmul.msk.f32.vlgmr.msrb.gmra.mxu0 %vm57_vm0, %v1472_v28  ;;  %583 = vmatpush.msrb.mxu1 %v1237_v19  ;;  %v1250_v19 = vld [vmem:[%s1849_s2 + $0x88] sm:$0xff] }
  0x37   :  { %1262 = vmatmul.msk.f32.vlgmr.msrb.gmra.mxu1 %vm57_vm0, %v1472_v28  ;;  %601 = vmatpush.msrb.mxu2 %v1243_v21 }
  0x38   :  { %621 = vmatpush.msrb.mxu3 %v1247_v22  ;;  %480 = vmatpush.msra.mxu0 %v1220_v25  ;;  %v1254_v22 = vld [vmem:[%s1849_s2 + $0xa8] sm:$0xff]  ;;  %v1251_v25 = vld [vmem:[%s1849_s2 + $0x90] sm:$0xff] }
  0x39   :  { %602 = vmatpush.msrb.mxu2 %v1242_v23 }
  0x3a   :  { %622 = vmatpush.msrb.mxu3 %v1246_v24  ;;  %481 = vmatpush.msra.mxu0 %v1219_v29 }
  0x3b   :  { %603 = vmatpush.msrb.mxu2 %v1241_v26  ;;  %v1252_v26 = vld [vmem:[%s1849_s2 + $0x98] sm:$0xff] }
  0x3c   :  { %623 = vmatpush.msrb.mxu3 %v1245_v27  ;;  %1263 = vmatmul.msk.f32.vlgmr.msrb.gmra.mxu2 %vm57_vm0, %v1472_v28 }
  0x3d   :  { %1264 = vmatmul.msk.f32.vlgmr.msrb.gmra.mxu3 %vm57_vm0, %v1472_v28  ;;  %482 = vmatpush.msra.mxu0 %v1218_v30 }
  0x3f   :  { %483 = vmatpush.msra.mxu0 %v1217_v31 }
  0x40   :  { %1257 = vmatmul.msk.f32.vlgmr.msra.gmra.mxu0 %vm57_vm0, %v1416_v12 }
  0x41   :  { %560 = vmatpush.msrb.mxu0 %v1236_v32  ;;  %v1249_v32 = vld [vmem:[%s1849_s2 + $0x80] sm:$0xff] }
  0x43   :  { %561 = vmatpush.msrb.mxu0 %v1235_v33  ;;  %v1255_v33 = vld [vmem:[%s1849_s2 + $0xb0] sm:$0xff] }
  0x45   :  { %562 = vmatpush.msrb.mxu0 %v1234_v35 }
  0x47   :  { %563 = vmatpush.msrb.mxu0 %v1233_v36 }
  0x48   :  { %1261 = vmatmul.msk.f32.vlgmr.msrb.gmra.mxu0 %vm57_vm0, %v1472_v28  ;;  %v1203_v28 = vld [vmem:[%s1849_s2 + $0x50] sm:$0xff] }
  0x86   :  { %v98_v34 = vpop.f32.mrf.mxu1 }
  0x87   :  { %v99_v46 = vadd.f32 %v98_v34, %v50_v42  ;;  %v1256_v34 = vld [vmem:[%s1849_s2 + $0xb8] sm:$0xff] }
  0x8d   :  { %v118_v12 = vpop.f32.mrf.mxu2 }
  0x8e   :  { %v138_v37 = vpop.f32.mrf.mxu3  ;;  %v119_v57 = vadd.f32 %v118_v12, %v51_v50 }
  0x8f   :  { %v139_v58 = vadd.f32 %v138_v37, %v52_v51 }
  0x90   :  { %v181_v38 = vpop.f32.mrf.mxu1 }
  0x91   :  { %v182_v61 = vadd.f32 %v181_v38, %v54_v55 }
  0x95   :  { %v78_v44 = vpop.f32.mrf.mxu0 }
  0x96   :  { %v201_v39 = vpop.f32.mrf.mxu2  ;;  %v79_v13 = vadd.f32 %v78_v44, %v49_v7 }
  0x97   :  { %v221_v40 = vpop.f32.mrf.mxu3  ;;  %v202_v9 = vadd.f32 %v201_v39, %v55_v2 }
  0x98   :  { %v222_v10 = vadd.f32 %v221_v40, %v56_v3  ;;  %v1253_v40 = vld [vmem:[%s1849_s2 + $0xa0] sm:$0xff]  ;;  %s1352_s2 = smov 8  }
  0x99   :  { %v303_v43 = vpop.f32.mrf.mxu1 }
  0x9a   :  { %v304_v45 = vadd.f32 %v1202_v41, %v303_v43 }
  0x9c   :  { %1267 = vmatpush.xpose.msk.msra.mxu1 %vm628_vm1, %v304_v45 }
  0x9f   :  { %1268 = vmatmul.msk.f32.vlgmr.msra.gmra.mxu1 %vm628_vm1, %v99_v46 }
  0xa0   :  { %v323_v48 = vpop.f32.mrf.mxu2  ;;  %v343_v49 = vpop.f32.mrf.mxu3 }
  0xa1   :  { %v324_v52 = vadd.f32 %v1203_v28, %v323_v48  ;;  %v344_v53 = vadd.f32 %v1204_v47, %v343_v49 }
  0xa3   :  { %1269 = vmatpush.xpose.msk.msra.mxu2 %vm628_vm1, %v324_v52  ;;  %1271 = vmatpush.xpose.msk.msra.mxu3 %vm628_vm1, %v344_v53  ;;  %v161_v56 = vpop.f32.mrf.mxu0 }
  0xa4   :  { %v383_v59 = vpop.f32.mrf.mxu1  ;;  %v162_v18 = vadd.f32 %v161_v56, %v53_v15 }
  0xa5   :  { %v384_v60 = vadd.f32 %v1206_v54, %v383_v59 }
  0xa6   :  { %1270 = vmatmul.msk.f32.vlgmr.msra.gmra.mxu2 %vm628_vm1, %v119_v57  ;;  %1272 = vmatmul.msk.f32.vlgmr.msra.gmra.mxu3 %vm628_vm1, %v139_v58 }
  0xa7   :  { %1275 = vmatpush.xpose.msk.msrb.mxu1 %vm628_vm1, %v384_v60 }
  0xa8   :  { %v403_v0 = vpop.f32.mrf.mxu2  ;;  %v423_v1 = vpop.f32.mrf.mxu3 }
  0xa9   :  { %v404_v4 = vadd.f32 %v1207_v62, %v403_v0  ;;  %v424_v5 = vadd.f32 %v1208_v63, %v423_v1 }
  0xaa   :  { %1276 = vmatmul.msk.f32.vlgmr.msrb.gmra.mxu1 %vm628_vm1, %v182_v61 }
  0xab   :  { %1277 = vmatpush.xpose.msk.msrb.mxu2 %vm628_vm1, %v404_v4  ;;  %1279 = vmatpush.xpose.msk.msrb.mxu3 %vm628_vm1, %v424_v5  ;;  %v283_v8 = vpop.f32.mrf.mxu0 }
  0xac   :  { %v284_v11 = vadd.f32 %v1201_v6, %v283_v8  ;;  %v505_v20 = vpop.f32.mrf.mxu1 }
  0xad   :  { %v506_v21 = vadd.f32 %v1250_v19, %v505_v20 }
  0xae   :  { %1278 = vmatmul.msk.f32.vlgmr.msrb.gmra.mxu2 %vm628_vm1, %v202_v9  ;;  %1280 = vmatmul.msk.f32.vlgmr.msrb.gmra.mxu3 %vm628_vm1, %v222_v10 }
  0xaf   :  { %1265 = vmatpush.xpose.msk.msra.mxu0 %vm628_vm1, %v284_v11  ;;  %966 = vmatpush.msra.mxu1 %v506_v21 }
  0xb2   :  { %1266 = vmatmul.msk.f32.vlgmr.msra.gmra.mxu0 %vm628_vm1, %v79_v13 }
  0xb3   :  { %v363_v16 = vpop.f32.mrf.mxu0 }
  0xb4   :  { %v364_v17 = vadd.f32 %v1205_v14, %v363_v16  ;;  %v585_v23 = vpop.f32.mrf.mxu1 }
  0xb5   :  { %v586_v24 = vadd.f32 %v1254_v22, %v585_v23  ;;  %v525_v27 = vpop.f32.mrf.mxu2 }
  0xb6   :  { %1273 = vmatpush.xpose.msk.msrb.mxu0 %vm628_vm1, %v364_v17  ;;  %v526_v29 = vadd.f32 %v1251_v25, %v525_v27  ;;  %v545_v30 = vpop.f32.mrf.mxu3 }
  0xb7   :  { %1058 = vmatpush.msrb.mxu1 %v586_v24  ;;  %v546_v31 = vadd.f32 %v1252_v26, %v545_v30 }
  0xb8   :  { %989 = vmatpush.msra.mxu2 %v526_v29 }
  0xb9   :  { %1012 = vmatpush.msra.mxu3 %v546_v31 }
  0xba   :  { %1274 = vmatmul.msk.f32.vlgmr.msrb.gmra.mxu0 %vm628_vm1, %v162_v18 }
  0xbd   :  { %v485_v35 = vpop.f32.mrf.mxu0 }
  0xbe   :  { %v486_v12 = vadd.f32 %v1249_v32, %v485_v35 }
  0xbf   :  { %v605_v36 = vpop.f32.mrf.mxu2 }
  0xc0   :  { %v606_v37 = vadd.f32 %v1255_v33, %v605_v36  ;;  %v625_v38 = vpop.f32.mrf.mxu3  ;;  %943 = vmatpush.msra.mxu0 %v486_v12 }
  0xc1   :  { %v626_v39 = vadd.f32 %v1256_v34, %v625_v38 }
  0xc2   :  { %1081 = vmatpush.msrb.mxu2 %v606_v37 }
  0xc3   :  { %1104 = vmatpush.msrb.mxu3 %v626_v39 }
  0xc5   :  { %v565_v41 = vpop.f32.mrf.mxu0 }
  0xc6   :  { %v566_v42 = vadd.f32 %v1253_v40, %v565_v41 }
  0xc8   :  { %1035 = vmatpush.msrb.mxu0 %v566_v42 }
 0x11c   :  { %v678_v43 = vpop.f32.mrf.mxu1 }
 0x11d   :  { %v840_v44 = vsel %vm628_vm1, %v678_v43, -inf }
 0x11e   :  { %841 = vmax.xlane.f32.xlu1 %v840_v44 }
 0x127   :  { %v782_v53 = vpop.f32.mrf.mxu1 }
 0x128   :  { %v852_v57 = vsel %vm628_vm1, %v782_v53, -inf }
 0x129   :  { %v704_v45 = vpop.f32.mrf.mxu2  ;;  %v730_v46 = vpop.f32.mrf.mxu3 }
 0x12a   :  { %v843_v28 = vsel %vm628_vm1, %v704_v45, -inf  ;;  %v846_v51 = vsel %vm628_vm1, %v730_v46, -inf }
 0x12b   :  { %844 = vmax.xlane.f32.xlu0 %v843_v28 }
 0x12f   :  { %v652_v47 = vpop.f32.mrf.mxu0 }
 0x130   :  { %v837_v55 = vsel %vm628_vm1, %v652_v47, -inf }
 0x131   :  { %v808_v48 = vpop.f32.mrf.mxu2  ;;  %v834_v49 = vpop.f32.mrf.mxu3 }
 0x132   :  { %v858_v50 = vsel %vm628_vm1, %v834_v49, -inf  ;;  %v855_v52 = vsel %vm628_vm1, %v808_v48, -inf }
 0x133   :  { %859 = vmax.xlane.f32.xlu2 %v858_v50  ;;  %847 = vmax.xlane.f32.xlu0 %v846_v51 }
 0x134   :  { %856 = vmax.xlane.f32.xlu1 %v855_v52 }
 0x137   :  { %v756_v54 = vpop.f32.mrf.mxu0 }
 0x138   :  { %v849_v56 = vsel %vm628_vm1, %v756_v54, -inf }
 0x13b   :  { %853 = vmax.xlane.f32.xlu2 %v852_v57  ;;  %838 = vmax.xlane.f32.xlu0 %v837_v55 }
 0x13c   :  { %850 = vmax.xlane.f32.xlu1 %v849_v56 }
 0x191   :  { %v842_v58 = vpop.xlane.xlu1 %841 }
 0x192   :  { %v862_v59 = vsub.f32 %v678_v43, %v842_v58 }
 0x194   :  { %v871_v60 = vmul.f32 1.442695, %v862_v59 }
 0x196   :  { %1294 = vpow2.f32 %v871_v60 }
 0x19c   :  { %v1295_v61 = vpop.eup %1294 }
 0x19d   :  { %v888_v62 = vsel %vm628_vm1, %v1295_v61, 0.0 }
 0x19e   :  { %v845_v63 = vpop.xlane.xlu0 %844  ;;  %889 = vadd.xlane.f32.xlu1 %v888_v62 }
 0x19f   :  { %v863_v0 = vsub.f32 %v704_v45, %v845_v63 }
 0x1a1   :  { %v873_v1 = vmul.f32 1.442695, %v863_v0 }
 0x1a3   :  { %1296 = vpow2.f32 %v873_v1 }
 0x1a6   :  { %v860_v2 = vpop.xlane.xlu2 %859  ;;  %v848_v3 = vpop.xlane.xlu0 %847 }
 0x1a7   :  { %v864_v4 = vsub.f32 %v730_v46, %v848_v3  ;;  %v857_v5 = vpop.xlane.xlu1 %856  ;;  %v868_v9 = vsub.f32 %v834_v49, %v860_v2 }
 0x1a8   :  { %v867_v6 = vsub.f32 %v808_v48, %v857_v5 }
 0x1a9   :  { %v1297_v7 = vpop.eup %1296  ;;  %v875_v8 = vmul.f32 1.442695, %v864_v4  ;;  %v883_v13 = vmul.f32 1.442695, %v868_v9 }
 0x1aa   :  { %v881_v10 = vmul.f32 1.442695, %v867_v6  ;;  %v891_v11 = vsel %vm628_vm1, %v1297_v7, 0.0 }
 0x1ab   :  { %892 = vadd.xlane.f32.xlu2 %v891_v11  ;;  %1298 = vpow2.f32 %v875_v8 }
 0x1ac   :  { %1300 = vpow2.f32 %v881_v10 }
 0x1ad   :  { %1302 = vpow2.f32 %v883_v13 }
 0x1ae   :  { %v854_v14 = vpop.xlane.xlu2 %853  ;;  %v839_v15 = vpop.xlane.xlu0 %838 }
 0x1af   :  { %v866_v16 = vsub.f32 %v782_v53, %v854_v14  ;;  %v861_v17 = vsub.f32 %v652_v47, %v839_v15  ;;  %v851_v18 = vpop.xlane.xlu1 %850 }
 0x1b0   :  { %v865_v22 = vsub.f32 %v756_v54, %v851_v18 }
 0x1b1   :  { %v879_v19 = vmul.f32 1.442695, %v866_v16  ;;  %v869_v20 = vmul.f32 1.442695, %v861_v17  ;;  %v1299_v21 = vpop.eup %1298 }
 0x1b2   :  { %v1301_v23 = vpop.eup %1300  ;;  %v894_v24 = vsel %vm628_vm1, %v1299_v21, 0.0  ;;  %v877_v26 = vmul.f32 1.442695, %v865_v22 }
 0x1b3   :  { %1304 = vpow2.f32 %v879_v19  ;;  %v903_v25 = vsel %vm628_vm1, %v1301_v23, 0.0  ;;  %895 = vadd.xlane.f32.xlu0 %v894_v24  ;;  %v1303_v27 = vpop.eup %1302 }
 0x1b4   :  { %1306 = vpow2.f32 %v869_v20  ;;  %904 = vadd.xlane.f32.xlu2 %v903_v25  ;;  %v906_v32 = vsel %vm628_vm1, %v1303_v27, 0.0 }
 0x1b5   :  { %1308 = vpow2.f32 %v877_v26 }
 0x1b9   :  { %v1305_v29 = vpop.eup %1304 }
 0x1ba   :  { %v1307_v30 = vpop.eup %1306  ;;  %v900_v31 = vsel %vm628_vm1, %v1305_v29, 0.0 }
 0x1bb   :  { %v885_v33 = vsel %vm628_vm1, %v1307_v30, 0.0  ;;  %901 = vadd.xlane.f32.xlu1 %v900_v31  ;;  %907 = vadd.xlane.f32.xlu0 %v906_v32  ;;  %v1309_v34 = vpop.eup %1308 }
 0x1bc   :  { %886 = vadd.xlane.f32.xlu2 %v885_v33  ;;  %v897_v35 = vsel %vm628_vm1, %v1309_v34, 0.0 }
 0x1c3   :  { %898 = vadd.xlane.f32.xlu0 %v897_v35 }
 0x211   :  { %v890_v36 = vpop.xlane.xlu1 %889 }
 0x212   :  { %1310 = vrcp.f32 %v890_v36 }
 0x218   :  { %v1311_v12 = vpop.eup %1310 }
 0x219   :  { %v918_v37 = vmul.f32 %v1311_v12, %v1295_v61 }
 0x21b   :  { %1282 = vmatmul.msk.f32.vlgmr.msra.gmra.mxu1 %vm628_vm1, %v918_v37 }
 0x21e   :  { %v893_v38 = vpop.xlane.xlu2 %892 }
 0x21f   :  { %1312 = vrcp.f32 %v893_v38 }
 0x225   :  { %v1313_v39 = vpop.eup %1312 }
 0x226   :  { %v919_v40 = vmul.f32 %v1313_v39, %v1297_v7  ;;  %v896_v41 = vpop.xlane.xlu0 %895 }
 0x227   :  { %v905_v42 = vpop.xlane.xlu2 %904  ;;  %1314 = vrcp.f32 %v896_v41 }
 0x228   :  { %1283 = vmatmul.msk.f32.vlgmr.msra.gmra.mxu2 %vm628_vm1, %v919_v40  ;;  %1316 = vrcp.f32 %v905_v42 }
 0x22d   :  { %v1315_v43 = vpop.eup %1314 }
 0x22e   :  { %v902_v44 = vpop.xlane.xlu1 %901  ;;  %v1317_v45 = vpop.eup %1316  ;;  %v920_v46 = vmul.f32 %v1315_v43, %v1299_v21 }
 0x22f   :  { %v908_v28 = vpop.xlane.xlu0 %907  ;;  %1318 = vrcp.f32 %v902_v44  ;;  %v923_v47 = vmul.f32 %v1317_v45, %v1301_v23  ;;  %v887_v48 = vpop.xlane.xlu2 %886 }
 0x230   :  { %1320 = vrcp.f32 %v908_v28  ;;  %1284 = vmatmul.msk.f32.vlgmr.msra.gmra.mxu3 %vm628_vm1, %v920_v46 }
 0x231   :  { %1322 = vrcp.f32 %v887_v48  ;;  %1287 = vmatmul.msk.f32.vlgmr.msrb.gmra.mxu2 %vm628_vm1, %v923_v47 }
 0x235   :  { %v1319_v49 = vpop.eup %1318 }
 0x236   :  { %v1321_v50 = vpop.eup %1320  ;;  %v922_v51 = vmul.f32 %v1319_v49, %v1305_v29 }
 0x237   :  { %v1323_v52 = vpop.eup %1322  ;;  %v924_v53 = vmul.f32 %v1321_v50, %v1303_v27  ;;  %v899_v54 = vpop.xlane.xlu0 %898 }
 0x238   :  { %v917_v55 = vmul.f32 %v1323_v52, %v1307_v30  ;;  %1324 = vrcp.f32 %v899_v54  ;;  %1286 = vmatmul.msk.f32.vlgmr.msrb.gmra.mxu1 %vm628_vm1, %v922_v51 }
 0x239   :  { %1288 = vmatmul.msk.f32.vlgmr.msrb.gmra.mxu3 %vm628_vm1, %v924_v53 }
 0x23a   :  { %1281 = vmatmul.msk.f32.vlgmr.msra.gmra.mxu0 %vm628_vm1, %v917_v55 }
 0x23e   :  { %v1325_v56 = vpop.eup %1324 }
 0x23f   :  { %v921_v57 = vmul.f32 %v1325_v56, %v1309_v34 }
 0x242   :  { %1285 = vmatmul.msk.f32.vlgmr.msrb.gmra.mxu0 %vm628_vm1, %v921_v57 }
 0x298   :  { %v968_v58 = vpop.f32.mrf.mxu1 }
 0x299   :  { %1110 = vrot.lane.b32.xlu1 %v968_v58, %s1352_s2 }
 0x2ab   :  { %v991_v59 = vpop.f32.mrf.mxu2 }
 0x2ac   :  { %1114 = vrot.lane.b32.xlu0 %v991_v59, %s1353_s4 }
 0x2b3   :  { %v1014_v60 = vpop.f32.mrf.mxu3 }
 0x2b4   :  { %1118 = vrot.lane.b32.xlu1 %v1014_v60, %s1354_s5  ;;  %v1083_v63 = vpop.f32.mrf.mxu2 }
 0x2b5   :  { %v1060_v61 = vpop.f32.mrf.mxu1 }
 0x2b6   :  { %1127 = vrot.lane.b32.xlu2 %v1060_v61, %s1352_s2 }
 0x2b7   :  { %v945_v2 = vpop.f32.mrf.mxu0 }
 0x2bc   :  { %v1106_v62 = vpop.f32.mrf.mxu3 }
 0x2bd   :  { %1135 = vrot.lane.b32.xlu0 %v1106_v62, %s1354_s5 }
 0x2be   :  { %1131 = vrot.lane.b32.xlu2 %v1083_v63, %s1353_s4 }
 0x2bf   :  { %v1037_v9 = vpop.f32.mrf.mxu0 }
 0x30b   :  { %v1111_v0 = vpop.permute.xlu1 %1110 }
 0x30c   :  { %v1121_v4 = vsel %vm628_vm1, %v945_v2, %v1111_v0 }
 0x310   :  { %v1128_v1 = vpop.permute.xlu2 %1127 }
 0x311   :  { %v1138_v10 = vsel %vm628_vm1, %v1037_v9, %v1128_v1 }
 0x318   :  { %v1132_v8 = vpop.permute.xlu2 %1131 }
 0x319   :  { %v1139_v11 = vsel %vm1122_vm3, %v1138_v10, %v1132_v8 }
 0x31e   :  { %v1115_v3 = vpop.permute.xlu0 %1114 }
 0x31f   :  { %v1123_v5 = vsel %vm1122_vm3, %v1121_v4, %v1115_v3 }
 0x326   :  { %v1119_v6 = vpop.permute.xlu1 %1118 }
 0x327   :  { %v1125_v7 = vsel %vm1124_vm2, %v1123_v5, %v1119_v6 }
 0x328   :  { %1141 = vst.msk [vmem:[#allocation2] sm:$0xff] %vm57_vm0, %v1125_v7 }
 0x32f   :  { %v1136_v13 = vpop.permute.xlu0 %1135 }
 0x330   :  { %v1140_v14 = vsel %vm1124_vm2, %v1139_v11, %v1136_v13 }
 0x331   :  { %1142 = vst.msk [vmem:[#allocation2 + $0x8] sm:$0xff] %vm57_vm0, %v1140_v14 }
 0x332   :  { %1155 = dma.vmem_to_hbm [thread:$0]  %s1148_s7, 256, %s1150_s10, [#allocation3], %s1356_s11, %s1356_s11, %s1352_s2  }
 0x333   :  { %1350 = dma.done.wait [#allocation3], 256  }
 0x334   :  { %1351 = vsyncadd [#allocation3], 4294967040 }
 0x335   :  { %1160 = vsyncpa [#allocation3], 1 }

</bundles_post_ra>
